<compile_context>
chip_gen: v7x
topology: tpu7x:2x2x1
jax: 0.10.0
libtpu: 0.0.40
codegen_flags: <defaults>
</compile_context>

<pallas_src>
import jax
import jax.numpy as jnp
from jax.experimental import pallas as pl
from jax.experimental.pallas import tpu as pltpu  # noqa: F401  (TPU backend)

# ----------------------------- configuration --------------------------------
B, C, H, W = 2, 4, 16, 16          # batch, channels, spatial
PATCH = 4                          # dino patch size
HP, WP = H // PATCH, W // PATCH    # patch grid
D = 32                             # dino feature / uniseg hidden dim
K = 8                              # number of segmentation classes
NUM_TASKS = 3

NPIX = B * H * W                   # 512 pixels
PDIM = C * PATCH * PATCH           # 64  flattened patch vector length
CDIM = C + PDIM + 1                # 69  fused contraction (x_cm ; xp_rep ; ones)
CPAD = 72                          # contraction padded to a sublane multiple
DH = CPAD                          # padded hidden rows (aligned slab slices)


# --------------------------- fused kernel (Pallas) ---------------------------
def _fused_kernel(x_ref, w_ref, o_ref):
    # h = ReLU( [w1.T | w_patch.T | bias] @ [x_cm ; xp_rep ; ones] )   (DH, 512)
    h = jnp.dot(w_ref[0:DH, :], x_ref[...], preferred_element_type=jnp.float32)
    h = jnp.maximum(h, 0.0)
    # logits = [w2.T | b2 | 0] @ h          lane-dense (K, 512)
    o_ref[...] = jnp.dot(w_ref[DH:DH + K, :], h,
                         preferred_element_type=jnp.float32)


# ---------------------------- combined model ---------------------------------
@jax.jit
def combined_model(x_nchw, task_id, dino_params, uniseg_params):
    w_patch, b_patch = dino_params                      # (PDIM, D), (D,)
    w1, b1, task_embeddings, w2, b2 = uniseg_params     # (C,D),(D,),(T,D),(D,K),(K,)

    # ---- activation slab: pixel columns in plain (b, h, w) order ----
    x_cm = x_nchw.transpose(1, 0, 2, 3).reshape(C, NPIX)             # (4, 512)

    # nearest-neighbour "upsample" precomputed as a broadcast: per-pixel im2col
    # patch vector (rows ordered (c, ph, pw), matching w_patch's rows).
    xv = x_nchw.reshape(B, C, HP, PATCH, WP, PATCH)
    xp = xv.transpose(1, 3, 5, 0, 2, 4).reshape(PDIM, B, HP, WP)     # (64, B, HP, WP)
    xp_rep = jnp.broadcast_to(
        xp[:, :, :, None, :, None],
        (PDIM, B, HP, PATCH, WP, PATCH)).reshape(PDIM, NPIX)         # (64, 512)

    ones_row = jnp.ones((1, NPIX), jnp.float32)
    x_slab = jnp.concatenate([x_cm, xp_rep, ones_row], axis=0)       # (69, 512)
    x_slab = jnp.pad(x_slab, ((0, CPAD - CDIM), (0, 0)))             # (72, 512)

    # ---- weight slab: all params (+ biases, + task embedding) in one array ----
    # TODO(synk): dino/uniseg are synthetic stand-ins; the bias fold assumes the
    # task embedding is added pre-ReLU and the upsample is nearest-neighbour.
    bias1 = b1 + b_patch + task_embeddings[task_id]                  # (D,)
    w1_blk = jnp.concatenate([w1.T, w_patch.T, bias1[:, None]], axis=1)  # (D, 69)
    w1_aug = jnp.zeros((DH, CPAD), jnp.float32)
    w1_aug = w1_aug.at[0:D, 0:CDIM].set(w1_blk)
    w1_aug = w1_aug.at[D, CDIM - 1].set(1.0)        # bias-passthrough -> h[D,:]=1
    w2_aug = jnp.zeros((K, CPAD), jnp.float32)
    w2_aug = w2_aug.at[:, 0:D].set(w2.T)
    w2_aug = w2_aug.at[:, D].set(b2)                # b2 folded via passthrough row
    w_slab = jnp.concatenate([w1_aug, w2_aug], axis=0)               # (80, 72)

    out_t = pl.pallas_call(
        _fused_kernel,
        out_shape=jax.ShapeDtypeStruct((K, NPIX), jnp.float32),
        grid=(1,),
        in_specs=[
            pl.BlockSpec((CPAD, NPIX), lambda i: (0, 0)),   # activation slab
            pl.BlockSpec((DH + K, CPAD), lambda i: (0, 0)), # weight slab
        ],
        out_specs=pl.BlockSpec((K, NPIX), lambda i: (0, 0)),
    )(x_slab, w_slab)

    # (K, NPIX) with cols ordered (b, h, w)  ->  (B, K, H, W)
    return out_t.reshape(K, B, H, W).transpose(1, 0, 2, 3)


# ------------------------------- entrypoint -----------------------------------
if __name__ == "__main__":
    key = jax.random.PRNGKey(0)
    kx, k1, k2, k3, k4, k5, k6, k7 = jax.random.split(key, 8)

    x = jax.random.normal(kx, (B, C, H, W), dtype=jnp.float32)
    task_id = jnp.int32(1)

    # dino params
    w_patch = jax.random.normal(k1, (PDIM, D), dtype=jnp.float32) * 0.05
    b_patch = jax.random.normal(k2, (D,), dtype=jnp.float32) * 0.05
    dino_params = (w_patch, b_patch)

    # uniseg params
    w1 = jax.random.normal(k3, (C, D), dtype=jnp.float32) * 0.1
    b1 = jax.random.normal(k4, (D,), dtype=jnp.float32) * 0.1
    task_embeddings = jax.random.normal(k5, (NUM_TASKS, D), dtype=jnp.float32) * 0.1
    w2 = jax.random.normal(k6, (D, K), dtype=jnp.float32) * 0.1
    b2 = jax.random.normal(k7, (K,), dtype=jnp.float32) * 0.1
    uniseg_params = (w1, b1, task_embeddings, w2, b2)

    out = combined_model(x, task_id, dino_params, uniseg_params)
    out = jax.block_until_ready(out)
    assert out.shape == (B, K, H, W), out.shape
    print("KERNEL_OK")
</pallas_src>

<mosaic_0001>
module attributes {stable_mosaic.version = 11 : i64} {
  func.func @_fused_kernel(%arg0: i32, %arg1: memref<72x512xf32, #tpu.memory_space<vmem>>, %arg2: memref<80x72xf32, #tpu.memory_space<vmem>>, %arg3: memref<8x512xf32, #tpu.memory_space<vmem>>) attributes {dimension_semantics = [#tpu.dimension_semantics<arbitrary>], iteration_bounds = array<i64: 1>, scalar_prefetch = 0 : i64, scratch_operands = 0 : i64, tpu.core_type = #tpu.core_type<tc>, window_params = [{pipeline_mode = #tpu.pipeline_mode<synchronous>, transform_indices = @transform_0, window_bounds = array<i64: 72, 512>}, {pipeline_mode = #tpu.pipeline_mode<synchronous>, transform_indices = @transform_1, window_bounds = array<i64: 80, 72>}, {pipeline_mode = #tpu.pipeline_mode<synchronous>, transform_indices = @transform_2, window_bounds = array<i64: 8, 512>}]} {
    %c0 = arith.constant 0 : index
    %c0_0 = arith.constant 0 : index
    %0 = vector.load %arg2[%c0, %c0_0] : memref<80x72xf32, #tpu.memory_space<vmem>>, vector<72x72xf32>
    %c0_1 = arith.constant 0 : index
    %c0_2 = arith.constant 0 : index
    %1 = vector.load %arg1[%c0_1, %c0_2] : memref<72x512xf32, #tpu.memory_space<vmem>>, vector<72x512xf32>
    %cst = arith.constant dense<0.000000e+00> : vector<72x512xf32>
    %2 = tpu.matmul %0, %1, %cst {dimension_numbers = #tpu.dot_dimension_numbers<[1], [0], [0], [1], [0, 0, 1, 1], [], []>} : vector<72x72xf32>, vector<72x512xf32>, vector<72x512xf32> -> vector<72x512xf32>
    %cst_3 = arith.constant 0.000000e+00 : f32
    %3 = vector.broadcast %cst_3 : f32 to vector<72x512xf32>
    %4 = arith.maximumf %2, %3 : vector<72x512xf32>
    %c72 = arith.constant 72 : index
    %c0_4 = arith.constant 0 : index
    %5 = vector.load %arg2[%c72, %c0_4] : memref<80x72xf32, #tpu.memory_space<vmem>>, vector<8x72xf32>
    %cst_5 = arith.constant dense<0.000000e+00> : vector<8x512xf32>
    %6 = tpu.matmul %5, %4, %cst_5 {dimension_numbers = #tpu.dot_dimension_numbers<[1], [0], [0], [1], [0, 0, 1, 1], [], []>} : vector<8x72xf32>, vector<72x512xf32>, vector<8x512xf32> -> vector<8x512xf32>
    %c0_6 = arith.constant 0 : index
    %c0_7 = arith.constant 0 : index
    %7 = vector.load %arg3[%c0_6, %c0_7] : memref<8x512xf32, #tpu.memory_space<vmem>>, vector<8x512xf32>
    tpu.vector_store %arg3[%c0_6, %c0_7], %6 {strides = array<i32>} : memref<8x512xf32, #tpu.memory_space<vmem>>, vector<8x512xf32>,
    return
  }
  func.func @transform_0(%arg0: i32) -> (i32, i32) {
    %c0_i32 = arith.constant 0 : i32
    %c0_i32_0 = arith.constant 0 : i32
    %c0_i32_1 = arith.constant 0 : i32
    return %c0_i32, %c0_i32_0 : i32, i32
  }
  func.func @transform_1(%arg0: i32) -> (i32, i32) {
    %c0_i32 = arith.constant 0 : i32
    %c0_i32_0 = arith.constant 0 : i32
    %c0_i32_1 = arith.constant 0 : i32
    return %c0_i32, %c0_i32_0 : i32, i32
  }
  func.func @transform_2(%arg0: i32) -> (i32, i32) {
    %c0_i32 = arith.constant 0 : i32
    %c0_i32_0 = arith.constant 0 : i32
    %c0_i32_1 = arith.constant 0 : i32
    return %c0_i32, %c0_i32_0 : i32, i32
  }
}

</mosaic_0001>

<bundles_post_ra>
// kernel: combined_model.1
= control target key start
LH: loop header
LB: loop body
LE: loop exit
PB: predicated region body
PF: predicated region fallthrough
CT: control target
= control target key end

     0   :  { %v597_v3 = vmov 0.0   ;;  %vm56_vm0 = vcmask 588800   ;;  %s803_s0 = inlined_call_operand.vmem [shape: f32[72,512], index: 0, kind: input, shape index: {}]   ;;  %s804_s1 = inlined_call_operand.vmem [shape: f32[80,72], index: 1, kind: input, shape index: {}]   ;;  %s805_s2 = inlined_call_operand.vmem [shape: f32[8,512], index: 2, kind: output, shape index: {}]  }
   0x1   :  { %v21_v0 = vld [vmem:[%s803_s0 + $0x8] sm:$0xff]  ;;  %v23_v2 = vld [vmem:[%s803_s0 + $0x18] sm:$0xff]  ;;  %148 = vmatprep.mubr.f32.mxu0 %v597_v3  ;;  %267 = vmatprep.mubr.f32.mxu1 %v597_v3  ;;  %v20_v6 = vld [vmem:[%s803_s0] sm:$0xff] }
   0x2   :  { %v25_v1 = vld [vmem:[%s803_s0 + $0x28] sm:$0xff]  ;;  %v27_v5 = vld [vmem:[%s803_s0 + $0x38] sm:$0xff]  ;;  %v24_v7 = vld [vmem:[%s803_s0 + $0x20] sm:$0xff] }
   0x3   :  { %v532_v4 = vpack.c.bf16 %v25_v1, %v21_v0  ;;  %v548_v8 = vpack.c.bf16 %v27_v5, %v23_v2  ;;  %v534_v9 = vpack.c.bf16 %v24_v7, %v20_v6  ;;  %v22_v10 = vld [vmem:[%s803_s0 + $0x10] sm:$0xff]  ;;  %v29_v12 = vld [vmem:[%s803_s0 + $0x48] sm:$0xff]  ;;  %v31_v15 = vld [vmem:[%s803_s0 + $0x58] sm:$0xff] }
   0x4   :  { %v26_v11 = vld [vmem:[%s803_s0 + $0x30] sm:$0xff]  ;;  %v33_v14 = vld [vmem:[%s803_s0 + $0x68] sm:$0xff]  ;;  %v35_v16 = vld [vmem:[%s803_s0 + $0x78] sm:$0xff] }
   0x5   :  { %533 = vmatprep.subr.bf16.mxu0 %v532_v4  ;;  %v550_v13 = vpack.c.bf16 %v26_v11, %v22_v10  ;;  %549 = vmatprep.subr.bf16.mxu1 %v548_v8  ;;  %v536_v17 = vpack.c.bf16 %v33_v14, %v29_v12  ;;  %v552_v18 = vpack.c.bf16 %v35_v16, %v31_v15  ;;  %v28_v19 = vld [vmem:[%s803_s0 + $0x40] sm:$0xff]  ;;  %v30_v21 = vld [vmem:[%s803_s0 + $0x50] sm:$0xff]  ;;  %v37_v24 = vld [vmem:[%s803_s0 + $0x88] sm:$0xff] }
   0x6   :  { %535 = vmatpush1.bf16.msra.mxu0 %v534_v9  ;;  %v32_v20 = vld [vmem:[%s803_s0 + $0x60] sm:$0xff]  ;;  %v34_v23 = vld [vmem:[%s803_s0 + $0x70] sm:$0xff]  ;;  %v41_v25 = vld [vmem:[%s803_s0 + $0xa8] sm:$0xff] }
   0x7   :  { %551 = vmatpush1.bf16.msra.mxu1 %v550_v13  ;;  %v538_v22 = vpack.c.bf16 %v32_v20, %v28_v19  ;;  %537 = vmatprep.subr.bf16.mxu0 %v536_v17  ;;  %v554_v26 = vpack.c.bf16 %v34_v23, %v30_v21  ;;  %v540_v27 = vpack.c.bf16 %v41_v25, %v37_v24  ;;  %v39_v28 = vld [vmem:[%s803_s0 + $0x98] sm:$0xff]  ;;  %v36_v30 = vld [vmem:[%s803_s0 + $0x80] sm:$0xff]  ;;  %v38_v33 = vld [vmem:[%s803_s0 + $0x90] sm:$0xff] }
   0x8   :  { %553 = vmatprep.subr.bf16.mxu1 %v552_v18  ;;  %v43_v29 = vld [vmem:[%s803_s0 + $0xb8] sm:$0xff]  ;;  %v40_v32 = vld [vmem:[%s803_s0 + $0xa0] sm:$0xff]  ;;  %v42_v34 = vld [vmem:[%s803_s0 + $0xb0] sm:$0xff] }
   0x9   :  { %v556_v31 = vpack.c.bf16 %v43_v29, %v39_v28  ;;  %v542_v35 = vpack.c.bf16 %v40_v32, %v36_v30  ;;  %v45_v36 = vld [vmem:[%s803_s0 + $0xc8] sm:$0xff]  ;;  %v47_v38 = vld [vmem:[%s803_s0 + $0xd8] sm:$0xff]  ;;  %v558_v39 = vpack.c.bf16 %v42_v34, %v38_v33  ;;  %v44_v42 = vld [vmem:[%s803_s0 + $0xc0] sm:$0xff] }
   0xa   :  { %539 = vmatpush1.bf16.msra.mxu0 %v538_v22  ;;  %v49_v37 = vld [vmem:[%s803_s0 + $0xe8] sm:$0xff]  ;;  %v51_v41 = vld [vmem:[%s803_s0 + $0xf8] sm:$0xff]  ;;  %v48_v43 = vld [vmem:[%s803_s0 + $0xe0] sm:$0xff] }
   0xb   :  { %555 = vmatpush1.bf16.msra.mxu1 %v554_v26  ;;  %541 = vmatprep.subr.bf16.mxu0 %v540_v27  ;;  %v544_v40 = vpack.c.bf16 %v49_v37, %v45_v36  ;;  %v560_v44 = vpack.c.bf16 %v51_v41, %v47_v38  ;;  %v46_v45 = vld [vmem:[%s803_s0 + $0xd0] sm:$0xff]  ;;  %v546_v47 = vpack.c.bf16 %v48_v43, %v44_v42  ;;  %v53_v49 = vld [vmem:[%s803_s0 + $0x108] sm:$0xff]  ;;  %v55_v50 = vld [vmem:[%s803_s0 + $0x118] sm:$0xff] }
   0xc   :  { %557 = vmatprep.subr.bf16.mxu1 %v556_v31  ;;  %v50_v46 = vld [vmem:[%s803_s0 + $0xf0] sm:$0xff]  ;;  %v52_v51 = vld [vmem:[%s803_s0 + $0x100] sm:$0xff]  ;;  %v12_v54 = vld [vmem:[%s804_s1 + $0x8] sm:$0xff] }
   0xd   :  { %v562_v48 = vpack.c.bf16 %v50_v46, %v46_v45  ;;  %v54_v52 = vld [vmem:[%s803_s0 + $0x110] sm:$0xff]  ;;  %v11_v53 = vld [vmem:[%s804_s1] sm:$0xff]  ;;  %v14_v56 = vld [vmem:[%s804_s1 + $0x18] sm:$0xff] }
   0xe   :  { %543 = vmatpush1.bf16.msra.mxu0 %v542_v35  ;;  %v13_v55 = vld [vmem:[%s804_s1 + $0x10] sm:$0xff]  ;;  %v15_v57 = vld [vmem:[%s804_s1 + $0x20] sm:$0xff]  ;;  %v16_v58 = vld [vmem:[%s804_s1 + $0x28] sm:$0xff] }
   0xf   :  { %559 = vmatpush1.bf16.msra.mxu1 %v558_v39  ;;  %545 = vmatprep.subr.bf16.mxu0 %v544_v40  ;;  %v17_v59 = vld [vmem:[%s804_s1 + $0x30] sm:$0xff]  ;;  %v18_v60 = vld [vmem:[%s804_s1 + $0x38] sm:$0xff]  ;;  %v19_v61 = vld [vmem:[%s804_s1 + $0x40] sm:$0xff] }
  0x10   :  { %561 = vmatprep.subr.bf16.mxu1 %v560_v44 }
  0x12   :  { %547 = vmatpush1.bf16.msra.mxu0 %v546_v47 }
  0x13   :  { %563 = vmatpush1.bf16.msra.mxu1 %v562_v48  ;;  %100 = vmatprep.subr.mxu0 %v53_v49 }
  0x14   :  { %219 = vmatprep.subr.mxu1 %v55_v50 }
  0x16   :  { %101 = vmatpush1.msra.mxu0 %v52_v51 }
  0x17   :  { %220 = vmatpush1.msra.mxu1 %v54_v52  ;;  %512 = vmatmul.mubr.msk.f32.vlgmr.msra.gmra.mrb[0].mxu0 %vm56_vm0, %v11_v53 }
  0x18   :  { %521 = vmatmul.mubr.msk.f32.vlgmr.msra.gmra.mrb[0].mxu1 %vm56_vm0, %v11_v53  ;;  %154 = vmatprep.mubr.f32.mxu0 %v597_v3 }
  0x19   :  { %273 = vmatprep.mubr.f32.mxu1 %v597_v3 }
  0x1b   :  { %513 = vmatmul.mubr.msk.f32.gmra.mrb[2].mxu0 %vm56_vm0, %v12_v54 }
  0x1c   :  { %522 = vmatmul.mubr.msk.f32.gmra.mrb[2].mxu1 %vm56_vm0, %v12_v54  ;;  %160 = vmatprep.mubr.f32.mxu0 %v597_v3 }
  0x1d   :  { %279 = vmatprep.mubr.f32.mxu1 %v597_v3 }
  0x1f   :  { %514 = vmatmul.mubr.msk.f32.gmra.mrb[4].mxu0 %vm56_vm0, %v13_v55 }
  0x20   :  { %523 = vmatmul.mubr.msk.f32.gmra.mrb[4].mxu1 %vm56_vm0, %v13_v55  ;;  %166 = vmatprep.mubr.f32.mxu0 %v597_v3 }
  0x21   :  { %285 = vmatprep.mubr.f32.mxu1 %v597_v3 }
  0x23   :  { %515 = vmatmul.mubr.msk.f32.gmra.mrb[6].mxu0 %vm56_vm0, %v14_v56 }
  0x24   :  { %524 = vmatmul.mubr.msk.f32.gmra.mrb[6].mxu1 %vm56_vm0, %v14_v56  ;;  %172 = vmatprep.mubr.f32.mxu0 %v597_v3 }
  0x25   :  { %291 = vmatprep.mubr.f32.mxu1 %v597_v3 }
  0x27   :  { %516 = vmatmul.mubr.msk.f32.gmra.mrb[8].mxu0 %vm56_vm0, %v15_v57 }
  0x28   :  { %525 = vmatmul.mubr.msk.f32.gmra.mrb[8].mxu1 %vm56_vm0, %v15_v57  ;;  %178 = vmatprep.mubr.f32.mxu0 %v597_v3 }
  0x29   :  { %297 = vmatprep.mubr.f32.mxu1 %v597_v3 }
  0x2b   :  { %517 = vmatmul.mubr.msk.f32.gmra.mrb[10].mxu0 %vm56_vm0, %v16_v58 }
  0x2c   :  { %526 = vmatmul.mubr.msk.f32.gmra.mrb[10].mxu1 %vm56_vm0, %v16_v58  ;;  %184 = vmatprep.mubr.f32.mxu0 %v597_v3 }
  0x2d   :  { %303 = vmatprep.mubr.f32.mxu1 %v597_v3 }
  0x2f   :  { %518 = vmatmul.mubr.msk.f32.gmra.mrb[12].mxu0 %vm56_vm0, %v17_v59 }
  0x30   :  { %527 = vmatmul.mubr.msk.f32.gmra.mrb[12].mxu1 %vm56_vm0, %v17_v59  ;;  %190 = vmatprep.mubr.f32.mxu0 %v597_v3 }
  0x31   :  { %309 = vmatprep.mubr.f32.mxu1 %v597_v3 }
  0x33   :  { %519 = vmatmul.mubr.msk.f32.gmra.mrb[14].mxu0 %vm56_vm0, %v18_v60 }
  0x34   :  { %528 = vmatmul.mubr.msk.f32.gmra.mrb[14].mxu1 %vm56_vm0, %v18_v60  ;;  %196 = vmatprep.mubr.f32.mxu0 %v597_v3 }
  0x35   :  { %315 = vmatprep.mubr.f32.mxu1 %v597_v3 }
  0x37   :  { %520 = vmatmul.mubr.msk.f32.gmra.mrb[16].mxu0 %vm56_vm0, %v19_v61 }
  0x38   :  { %529 = vmatmul.mubr.msk.f32.gmra.mrb[16].mxu1 %vm56_vm0, %v19_v61  ;;  %426 = vmatprep.mubr.f32.mxu0 %v597_v3 }
  0x39   :  { %497 = vmatprep.mubr.f32.mxu1 %v597_v3 }
  0xea   :  { %v150_v62 = vpop.f32.mrb[0].mxu0 }
  0xeb   :  { %v269_v63 = vpop.f32.mrb[0].mxu1  ;;  %v152_v0 = vpop.f32.mrb[1].mxu0  ;;  %v322_v4 = vmax.f32 %v150_v62, 0.0 }
  0xec   :  { %v271_v1 = vpop.f32.mrb[1].mxu1  ;;  %v324_v8 = vmax.f32 %v269_v63, 0.0  ;;  %v323_v9 = vmax.f32 %v152_v0, 0.0 }
  0xed   :  { %v325_v13 = vmax.f32 %v271_v1, 0.0 }
  0xee   :  { %v156_v2 = vpop.f32.mrb[2].mxu0 }
  0xef   :  { %v326_v5 = vmax.f32 %v156_v2, 0.0  ;;  %v275_v6 = vpop.f32.mrb[2].mxu1  ;;  %v158_v7 = vpop.f32.mrb[3].mxu0 }
  0xf0   :  { %v328_v10 = vmax.f32 %v275_v6, 0.0  ;;  %v327_v11 = vmax.f32 %v158_v7, 0.0  ;;  %v277_v12 = vpop.f32.mrb[3].mxu1 }
  0xf1   :  { %v566_v14 = vpack.c.bf16 %v326_v5, %v322_v4  ;;  %v329_v15 = vmax.f32 %v277_v12, 0.0 }
  0xf2   :  { %v582_v16 = vpack.c.bf16 %v328_v10, %v324_v8  ;;  %v564_v17 = vpack.c.bf16 %v327_v11, %v323_v9  ;;  %v162_v3 = vpop.f32.mrb[4].mxu0 }
  0xf3   :  { %v580_v18 = vpack.c.bf16 %v329_v15, %v325_v13  ;;  %v281_v19 = vpop.f32.mrb[4].mxu1  ;;  %v164_v20 = vpop.f32.mrb[5].mxu0  ;;  %v330_v23 = vmax.f32 %v162_v3, 0.0 }
  0xf4   :  { %v283_v21 = vpop.f32.mrb[5].mxu1  ;;  %565 = vmatprep.subr.bf16.mxu0 %v564_v17  ;;  %v332_v27 = vmax.f32 %v281_v19, 0.0  ;;  %v331_v28 = vmax.f32 %v164_v20, 0.0 }
  0xf5   :  { %581 = vmatprep.subr.bf16.mxu1 %v580_v18  ;;  %567 = vmatpush1.bf16.msra.mxu0 %v566_v14  ;;  %v333_v32 = vmax.f32 %v283_v21, 0.0  ;;  %v358_v21 = vld [vmem:[%s804_s1 + $0x48] sm:$0xff] }
  0xf6   :  { %583 = vmatpush1.bf16.msra.mxu1 %v582_v16  ;;  %v168_v22 = vpop.f32.mrb[6].mxu0 }
  0xf7   :  { %v334_v24 = vmax.f32 %v168_v22, 0.0  ;;  %v287_v25 = vpop.f32.mrb[6].mxu1  ;;  %v170_v26 = vpop.f32.mrb[7].mxu0 }
  0xf8   :  { %v336_v29 = vmax.f32 %v287_v25, 0.0  ;;  %v335_v30 = vmax.f32 %v170_v26, 0.0  ;;  %v289_v31 = vpop.f32.mrb[7].mxu1 }
  0xf9   :  { %v570_v33 = vpack.c.bf16 %v334_v24, %v330_v23  ;;  %v337_v34 = vmax.f32 %v289_v31, 0.0 }
  0xfa   :  { %v586_v35 = vpack.c.bf16 %v336_v29, %v332_v27  ;;  %v568_v36 = vpack.c.bf16 %v335_v30, %v331_v28  ;;  %v174_v37 = vpop.f32.mrb[8].mxu0 }
  0xfb   :  { %v584_v38 = vpack.c.bf16 %v337_v34, %v333_v32  ;;  %v293_v39 = vpop.f32.mrb[8].mxu1  ;;  %v176_v40 = vpop.f32.mrb[9].mxu0  ;;  %v338_v43 = vmax.f32 %v174_v37, 0.0 }
  0xfc   :  { %v295_v41 = vpop.f32.mrb[9].mxu1  ;;  %569 = vmatprep.subr.bf16.mxu0 %v568_v36  ;;  %v340_v47 = vmax.f32 %v293_v39, 0.0  ;;  %v339_v48 = vmax.f32 %v176_v40, 0.0 }
  0xfd   :  { %585 = vmatprep.subr.bf16.mxu1 %v584_v38  ;;  %571 = vmatpush1.bf16.msra.mxu0 %v570_v33  ;;  %v341_v52 = vmax.f32 %v295_v41, 0.0 }
  0xfe   :  { %587 = vmatpush1.bf16.msra.mxu1 %v586_v35  ;;  %v180_v42 = vpop.f32.mrb[10].mxu0 }
  0xff   :  { %v342_v44 = vmax.f32 %v180_v42, 0.0  ;;  %v299_v45 = vpop.f32.mrb[10].mxu1  ;;  %v182_v46 = vpop.f32.mrb[11].mxu0 }
 0x100   :  { %v344_v49 = vmax.f32 %v299_v45, 0.0  ;;  %v343_v50 = vmax.f32 %v182_v46, 0.0  ;;  %v301_v51 = vpop.f32.mrb[11].mxu1 }
 0x101   :  { %v574_v53 = vpack.c.bf16 %v342_v44, %v338_v43  ;;  %v345_v54 = vmax.f32 %v301_v51, 0.0 }
 0x102   :  { %v590_v55 = vpack.c.bf16 %v344_v49, %v340_v47  ;;  %v572_v56 = vpack.c.bf16 %v343_v50, %v339_v48  ;;  %v186_v57 = vpop.f32.mrb[12].mxu0 }
 0x103   :  { %v588_v58 = vpack.c.bf16 %v345_v54, %v341_v52  ;;  %v305_v59 = vpop.f32.mrb[12].mxu1  ;;  %v188_v60 = vpop.f32.mrb[13].mxu0  ;;  %v346_v63 = vmax.f32 %v186_v57, 0.0 }
 0x104   :  { %v307_v61 = vpop.f32.mrb[13].mxu1  ;;  %573 = vmatprep.subr.bf16.mxu0 %v572_v56  ;;  %v348_v4 = vmax.f32 %v305_v59, 0.0  ;;  %v347_v5 = vmax.f32 %v188_v60, 0.0 }
 0x105   :  { %589 = vmatprep.subr.bf16.mxu1 %v588_v58  ;;  %575 = vmatpush1.bf16.msra.mxu0 %v574_v53  ;;  %v349_v9 = vmax.f32 %v307_v61, 0.0 }
 0x106   :  { %591 = vmatpush1.bf16.msra.mxu1 %v590_v55  ;;  %v192_v62 = vpop.f32.mrb[14].mxu0 }
 0x107   :  { %v350_v0 = vmax.f32 %v192_v62, 0.0  ;;  %v311_v1 = vpop.f32.mrb[14].mxu1  ;;  %v194_v2 = vpop.f32.mrb[15].mxu0 }
 0x108   :  { %v352_v6 = vmax.f32 %v311_v1, 0.0  ;;  %v351_v7 = vmax.f32 %v194_v2, 0.0  ;;  %v313_v8 = vpop.f32.mrb[15].mxu1 }
 0x109   :  { %v578_v10 = vpack.c.bf16 %v350_v0, %v346_v63  ;;  %v353_v11 = vmax.f32 %v313_v8, 0.0 }
 0x10a   :  { %v594_v12 = vpack.c.bf16 %v352_v6, %v348_v4  ;;  %v576_v13 = vpack.c.bf16 %v351_v7, %v347_v5  ;;  %v198_v14 = vpop.f32.mrb[16].mxu0 }
 0x10b   :  { %v592_v15 = vpack.c.bf16 %v353_v11, %v349_v9  ;;  %v317_v16 = vpop.f32.mrb[16].mxu1  ;;  %v200_v17 = vpop.f32.mrb[17].mxu0  ;;  %v354_v20 = vmax.f32 %v198_v14, 0.0 }
 0x10c   :  { %577 = vmatprep.subr.bf16.mxu0 %v576_v13  ;;  %v355_v3 = vmax.f32 %v200_v17, 0.0  ;;  %v319_v18 = vpop.f32.mrb[17].mxu1  ;;  %v356_v22 = vmax.f32 %v317_v16, 0.0 }
 0x10d   :  { %593 = vmatprep.subr.bf16.mxu1 %v592_v15  ;;  %579 = vmatpush1.bf16.msra.mxu0 %v578_v10  ;;  %v357_v19 = vmax.f32 %v319_v18, 0.0 }
 0x10e   :  { %595 = vmatpush1.bf16.msra.mxu1 %v594_v12  ;;  %378 = vmatprep.subr.mxu0 %v355_v3 }
 0x10f   :  { %449 = vmatprep.subr.mxu1 %v357_v19 }
 0x111   :  { %379 = vmatpush1.msra.mxu0 %v354_v20 }
 0x112   :  { %450 = vmatpush1.msra.mxu1 %v356_v22  ;;  %530 = vmatmul.mubr.msk.f32.vlgmr.msra.gmra.mrb[18].mxu0 %vm56_vm0, %v358_v21 }
 0x113   :  { %531 = vmatmul.mubr.msk.f32.vlgmr.msra.gmra.mrb[18].mxu1 %vm56_vm0, %v358_v21 }
 0x1e5   :  { %v428_v23 = vpop.f32.mrb[18].mxu0 }
 0x1e6   :  { %504 = vst [vmem:[%s805_s2] sm:$0xff] %v428_v23  ;;  %v499_v24 = vpop.f32.mrb[18].mxu1  ;;  %v430_v25 = vpop.f32.mrb[19].mxu0 }
 0x1e7   :  { %506 = vst [vmem:[%s805_s2 + $0x10] sm:$0xff] %v499_v24  ;;  %505 = vst [vmem:[%s805_s2 + $0x8] sm:$0xff] %v430_v25  ;;  %v501_v26 = vpop.f32.mrb[19].mxu1 }
 0x1e8   :  { %507 = vst [vmem:[%s805_s2 + $0x18] sm:$0xff] %v501_v26 }

</bundles_post_ra>
